<compile_context>
chip_gen: v7x
topology: tpu7x:2x2x1
jax: 0.10.0
libtpu: 0.0.40
codegen_flags: <defaults>
</compile_context>

<pallas_src>
import functools

import jax
import jax.numpy as jnp
from jax.experimental import pallas as pl
from jax.experimental.pallas import tpu as pltpu


def _leaky_relu(h, negative_slope=0.02):
    return jnp.where(h >= 0, h, negative_slope * h)


def _round_up(x, m):
    return (x + m - 1) // m * m


def mlp_kernel(x_ref,
               w1_ref, b1_ref,
               w2_ref, b2_ref,
               w3_ref, b3_ref,
               w4_ref, b4_ref,
               o_ref):
    """Fused MLP: (Linear -> LeakyReLU(0.02) -> [Dropout=id]) x3 -> Linear(.,1).

    Transposed orientation: activations are (features, tile_B) with the batch on
    the lane axis.  Matmuls hit the MXU with N = tile_B >= 128; LeakyReLU is VPU
    elementwise; the output store is a lane-dense (1, tile_B) row.
    """
    h = x_ref[...]  # (F, tile_B), float32

    h = jnp.dot(w1_ref[...], h, preferred_element_type=jnp.float32) + b1_ref[...]
    h = _leaky_relu(h)                    # (32, tile_B); Dropout(0.1) -> identity (eval)

    h = jnp.dot(w2_ref[...], h, preferred_element_type=jnp.float32) + b2_ref[...]
    h = _leaky_relu(h)                    # (16, tile_B)

    h = jnp.dot(w3_ref[...], h, preferred_element_type=jnp.float32) + b3_ref[...]
    h = _leaky_relu(h)                    # (8, tile_B)

    out = jnp.dot(w4_ref[...], h, preferred_element_type=jnp.float32) + b4_ref[...]
    o_ref[...] = out.astype(o_ref.dtype)  # (1, tile_B) lane-dense store


def init_mlp_params(key, input_size, hidden_sizes=(32, 16, 8)):
    """PyTorch-Linear-style init: U(-1/sqrt(fan_in), 1/sqrt(fan_in)).

    Weights are stored PyTorch-native (out_features, in_features);
    biases as (out_features, 1) so they broadcast along the lane (batch) axis.
    """
    sizes = [input_size] + list(hidden_sizes) + [1]
    params = []
    for i in range(len(sizes) - 1):
        fan_in, fan_out = sizes[i], sizes[i + 1]
        key, kw, kb = jax.random.split(key, 3)
        bound = 1.0 / float(fan_in) ** 0.5
        w = jax.random.uniform(kw, (fan_out, fan_in), jnp.float32, -bound, bound)
        b = jax.random.uniform(kb, (fan_out, 1), jnp.float32, -bound, bound)
        params.append((w, b))
    return params


@functools.partial(jax.jit, static_argnames=("batch_tile",))
def mlp_arch_forward(x, params, batch_tile=2048):
    """MLPArch.forward: regressor(x).squeeze(-1).  x: (B, input_size) float32."""
    B, F = x.shape
    (w1, b1), (w2, b2), (w3, b3), (w4, b4) = params

    # Tile sizing: multiple of 128 lanes, capped at batch_tile; pad batch so the
    # grid divides evenly (padded rows compute garbage that is sliced off).
    tile = _round_up(min(batch_tile, _round_up(B, 128)), 128)
    B_pad = _round_up(B, tile)

    # Layout plumbing: put batch on the lane (last) axis.
    xt = x.T  # (F, B)
    if B_pad != B:
        xt = jnp.pad(xt, ((0, 0), (0, B_pad - B)))

    weight_args = (w1, b1, w2, b2, w3, b3, w4, b4)
    # Tiny full-array (non-tiled) BlockSpecs: weights/biases stay resident in
    # VMEM across all batch tiles.
    weight_specs = [pl.BlockSpec(p.shape, lambda i: (0, 0)) for p in weight_args]

    flops = 2 * B_pad * sum(w.shape[0] * w.shape[1] for (w, _) in params)
    bytes_accessed = 4 * (B_pad * F + B_pad
                          + sum(w.size + b.size for (w, b) in params))

    out = pl.pallas_call(
        mlp_kernel,
        out_shape=jax.ShapeDtypeStruct((1, B_pad), jnp.float32),
        grid=(B_pad // tile,),
        in_specs=[pl.BlockSpec((F, tile), lambda i: (0, i))] + weight_specs,
        out_specs=pl.BlockSpec((1, tile), lambda i: (0, i)),
        compiler_params=pltpu.CompilerParams(
            dimension_semantics=("parallel",)),
        cost_estimate=pl.CostEstimate(flops=flops, transcendentals=0,
                                      bytes_accessed=bytes_accessed),
    )(xt, *weight_args)

    return out[0, :B]  # matches .squeeze(-1) in MLPArch.forward


def mlp_arch_reference(x, params):
    """Pure-JAX reference for correctness checking (PyTorch (out,in) weights)."""
    (w1, b1), (w2, b2), (w3, b3), (w4, b4) = params
    h = _leaky_relu(x @ w1.T + b1[:, 0])
    h = _leaky_relu(h @ w2.T + b2[:, 0])
    h = _leaky_relu(h @ w3.T + b3[:, 0])
    return (h @ w4.T + b4[:, 0]).squeeze(-1)


if __name__ == "__main__":
    key = jax.random.PRNGKey(0)
    k_x, k_p = jax.random.split(key)

    batch, input_size = 256, 16          # small shapes consistent with the module
    hidden_sizes = (32, 16, 8)           # MLPArch default

    x = jax.random.normal(k_x, (batch, input_size), jnp.float32)
    params = init_mlp_params(k_p, input_size, hidden_sizes)

    # batch_tile=128 keeps the demo tiny while still giving a 2-step "parallel"
    # grid (exercises megacore sharding on v7x). Default (2048) is for real use.
    y = mlp_arch_forward(x, params, batch_tile=128)
    y = jax.block_until_ready(y)

    y_ref = mlp_arch_reference(x, params)
    assert y.shape == (batch,), y.shape
    assert jnp.allclose(y, y_ref, atol=1e-4, rtol=1e-4), "mismatch vs reference"

    print("KERNEL_OK")
</pallas_src>

<mosaic_0001>
module attributes {stable_mosaic.version = 11 : i64} {
  func.func @mlp_kernel(%arg0: i32, %arg1: memref<16x128xf32, #tpu.memory_space<vmem>>, %arg2: memref<32x16xf32, #tpu.memory_space<vmem>>, %arg3: memref<32x1xf32, #tpu.memory_space<vmem>>, %arg4: memref<16x32xf32, #tpu.memory_space<vmem>>, %arg5: memref<16x1xf32, #tpu.memory_space<vmem>>, %arg6: memref<8x16xf32, #tpu.memory_space<vmem>>, %arg7: memref<8x1xf32, #tpu.memory_space<vmem>>, %arg8: memref<1x8xf32, #tpu.memory_space<vmem>>, %arg9: memref<1x1xf32, #tpu.memory_space<vmem>>, %arg10: memref<1x128xf32, #tpu.memory_space<vmem>>) attributes {dimension_semantics = [#tpu.dimension_semantics<parallel>], iteration_bounds = array<i64: 2>, scalar_prefetch = 0 : i64, scratch_operands = 0 : i64, tpu.core_type = #tpu.core_type<tc>, window_params = [{transform_indices = @transform_0, window_bounds = array<i64: 16, 128>}, {pipeline_mode = #tpu.pipeline_mode<synchronous>, transform_indices = @transform_1, window_bounds = array<i64: 32, 16>}, {pipeline_mode = #tpu.pipeline_mode<synchronous>, transform_indices = @transform_2, window_bounds = array<i64: 32, 1>}, {pipeline_mode = #tpu.pipeline_mode<synchronous>, transform_indices = @transform_3, window_bounds = array<i64: 16, 32>}, {pipeline_mode = #tpu.pipeline_mode<synchronous>, transform_indices = @transform_4, window_bounds = array<i64: 16, 1>}, {pipeline_mode = #tpu.pipeline_mode<synchronous>, transform_indices = @transform_5, window_bounds = array<i64: 8, 16>}, {pipeline_mode = #tpu.pipeline_mode<synchronous>, transform_indices = @transform_6, window_bounds = array<i64: 8, 1>}, {pipeline_mode = #tpu.pipeline_mode<synchronous>, transform_indices = @transform_7, window_bounds = array<i64: 1, 8>}, {pipeline_mode = #tpu.pipeline_mode<synchronous>, transform_indices = @transform_8, window_bounds = array<i64: 1, 1>}, {transform_indices = @transform_9, window_bounds = array<i64: 1, 128>}]} {
    %c0 = arith.constant 0 : index
    %c0_0 = arith.constant 0 : index
    %0 = vector.load %arg1[%c0, %c0_0] : memref<16x128xf32, #tpu.memory_space<vmem>>, vector<16x128xf32>
    %c0_1 = arith.constant 0 : index
    %c0_2 = arith.constant 0 : index
    %1 = vector.load %arg2[%c0_1, %c0_2] : memref<32x16xf32, #tpu.memory_space<vmem>>, vector<32x16xf32>
    %cst = arith.constant dense<0.000000e+00> : vector<32x128xf32>
    %2 = tpu.matmul %1, %0, %cst {dimension_numbers = #tpu.dot_dimension_numbers<[1], [0], [0], [1], [0, 0, 1, 1], [], []>} : vector<32x16xf32>, vector<16x128xf32>, vector<32x128xf32> -> vector<32x128xf32>
    %c0_3 = arith.constant 0 : index
    %c0_4 = arith.constant 0 : index
    %3 = vector.load %arg3[%c0_3, %c0_4] : memref<32x1xf32, #tpu.memory_space<vmem>>, vector<32x1xf32>
    %4 = vector.broadcast %3 : vector<32x1xf32> to vector<32x128xf32>
    %5 = arith.addf %2, %4 : vector<32x128xf32>
    %cst_5 = arith.constant 0.000000e+00 : f32
    %6 = vector.broadcast %cst_5 : f32 to vector<32x128xf32>
    %7 = arith.cmpf oge, %5, %6 : vector<32x128xf32>
    %cst_6 = arith.constant 2.000000e-02 : f32
    %8 = vector.broadcast %cst_6 : f32 to vector<32x128xf32>
    %9 = arith.mulf %8, %5 : vector<32x128xf32>
    %10 = arith.select %7, %5, %9 : vector<32x128xi1>, vector<32x128xf32>
    %c0_7 = arith.constant 0 : index
    %c0_8 = arith.constant 0 : index
    %11 = vector.load %arg4[%c0_7, %c0_8] : memref<16x32xf32, #tpu.memory_space<vmem>>, vector<16x32xf32>
    %cst_9 = arith.constant dense<0.000000e+00> : vector<16x128xf32>
    %12 = tpu.matmul %11, %10, %cst_9 {dimension_numbers = #tpu.dot_dimension_numbers<[1], [0], [0], [1], [0, 0, 1, 1], [], []>} : vector<16x32xf32>, vector<32x128xf32>, vector<16x128xf32> -> vector<16x128xf32>
    %c0_10 = arith.constant 0 : index
    %c0_11 = arith.constant 0 : index
    %13 = vector.load %arg5[%c0_10, %c0_11] : memref<16x1xf32, #tpu.memory_space<vmem>>, vector<16x1xf32>
    %14 = vector.broadcast %13 : vector<16x1xf32> to vector<16x128xf32>
    %15 = arith.addf %12, %14 : vector<16x128xf32>
    %cst_12 = arith.constant 0.000000e+00 : f32
    %16 = vector.broadcast %cst_12 : f32 to vector<16x128xf32>
    %17 = arith.cmpf oge, %15, %16 : vector<16x128xf32>
    %cst_13 = arith.constant 2.000000e-02 : f32
    %18 = vector.broadcast %cst_13 : f32 to vector<16x128xf32>
    %19 = arith.mulf %18, %15 : vector<16x128xf32>
    %20 = arith.select %17, %15, %19 : vector<16x128xi1>, vector<16x128xf32>
    %c0_14 = arith.constant 0 : index
    %c0_15 = arith.constant 0 : index
    %21 = vector.load %arg6[%c0_14, %c0_15] : memref<8x16xf32, #tpu.memory_space<vmem>>, vector<8x16xf32>
    %cst_16 = arith.constant dense<0.000000e+00> : vector<8x128xf32>
    %22 = tpu.matmul %21, %20, %cst_16 {dimension_numbers = #tpu.dot_dimension_numbers<[1], [0], [0], [1], [0, 0, 1, 1], [], []>} : vector<8x16xf32>, vector<16x128xf32>, vector<8x128xf32> -> vector<8x128xf32>
    %c0_17 = arith.constant 0 : index
    %c0_18 = arith.constant 0 : index
    %23 = vector.load %arg7[%c0_17, %c0_18] : memref<8x1xf32, #tpu.memory_space<vmem>>, vector<8x1xf32>
    %24 = vector.broadcast %23 : vector<8x1xf32> to vector<8x128xf32>
    %25 = arith.addf %22, %24 : vector<8x128xf32>
    %cst_19 = arith.constant 0.000000e+00 : f32
    %26 = vector.broadcast %cst_19 : f32 to vector<8x128xf32>
    %27 = arith.cmpf oge, %25, %26 : vector<8x128xf32>
    %cst_20 = arith.constant 2.000000e-02 : f32
    %28 = vector.broadcast %cst_20 : f32 to vector<8x128xf32>
    %29 = arith.mulf %28, %25 : vector<8x128xf32>
    %30 = arith.select %27, %25, %29 : vector<8x128xi1>, vector<8x128xf32>
    %c0_21 = arith.constant 0 : index
    %c0_22 = arith.constant 0 : index
    %31 = vector.load %arg8[%c0_21, %c0_22] : memref<1x8xf32, #tpu.memory_space<vmem>>, vector<1x8xf32>
    %cst_23 = arith.constant dense<0.000000e+00> : vector<1x128xf32>
    %32 = tpu.matmul %31, %30, %cst_23 {dimension_numbers = #tpu.dot_dimension_numbers<[1], [0], [0], [1], [0, 0, 1, 1], [], []>} : vector<1x8xf32>, vector<8x128xf32>, vector<1x128xf32> -> vector<1x128xf32>
    %c0_24 = arith.constant 0 : index
    %c0_25 = arith.constant 0 : index
    %33 = vector.load %arg9[%c0_24, %c0_25] : memref<1x1xf32, #tpu.memory_space<vmem>>, vector<1x1xf32>
    %34 = vector.broadcast %33 : vector<1x1xf32> to vector<1x128xf32>
    %35 = arith.addf %32, %34 : vector<1x128xf32>
    %c0_26 = arith.constant 0 : index
    %c0_27 = arith.constant 0 : index
    %36 = vector.load %arg10[%c0_26, %c0_27] : memref<1x128xf32, #tpu.memory_space<vmem>>, vector<1x128xf32>
    tpu.vector_store %arg10[%c0_26, %c0_27], %35 {strides = array<i32>} : memref<1x128xf32, #tpu.memory_space<vmem>>, vector<1x128xf32>,
    return
  }
  func.func @transform_0(%arg0: i32) -> (i32, i32) {
    %c0_i32 = arith.constant 0 : i32
    %c0_i32_0 = arith.constant 0 : i32
    return %c0_i32, %arg0 : i32, i32
  }
  func.func @transform_1(%arg0: i32) -> (i32, i32) {
    %c0_i32 = arith.constant 0 : i32
    %c0_i32_0 = arith.constant 0 : i32
    %c0_i32_1 = arith.constant 0 : i32
    return %c0_i32, %c0_i32_0 : i32, i32
  }
  func.func @transform_2(%arg0: i32) -> (i32, i32) {
    %c0_i32 = arith.constant 0 : i32
    %c0_i32_0 = arith.constant 0 : i32
    %c0_i32_1 = arith.constant 0 : i32
    return %c0_i32, %c0_i32_0 : i32, i32
  }
  func.func @transform_3(%arg0: i32) -> (i32, i32) {
    %c0_i32 = arith.constant 0 : i32
    %c0_i32_0 = arith.constant 0 : i32
    %c0_i32_1 = arith.constant 0 : i32
    return %c0_i32, %c0_i32_0 : i32, i32
  }
  func.func @transform_4(%arg0: i32) -> (i32, i32) {
    %c0_i32 = arith.constant 0 : i32
    %c0_i32_0 = arith.constant 0 : i32
    %c0_i32_1 = arith.constant 0 : i32
    return %c0_i32, %c0_i32_0 : i32, i32
  }
  func.func @transform_5(%arg0: i32) -> (i32, i32) {
    %c0_i32 = arith.constant 0 : i32
    %c0_i32_0 = arith.constant 0 : i32
    %c0_i32_1 = arith.constant 0 : i32
    return %c0_i32, %c0_i32_0 : i32, i32
  }
  func.func @transform_6(%arg0: i32) -> (i32, i32) {
    %c0_i32 = arith.constant 0 : i32
    %c0_i32_0 = arith.constant 0 : i32
    %c0_i32_1 = arith.constant 0 : i32
    return %c0_i32, %c0_i32_0 : i32, i32
  }
  func.func @transform_7(%arg0: i32) -> (i32, i32) {
    %c0_i32 = arith.constant 0 : i32
    %c0_i32_0 = arith.constant 0 : i32
    %c0_i32_1 = arith.constant 0 : i32
    return %c0_i32, %c0_i32_0 : i32, i32
  }
  func.func @transform_8(%arg0: i32) -> (i32, i32) {
    %c0_i32 = arith.constant 0 : i32
    %c0_i32_0 = arith.constant 0 : i32
    %c0_i32_1 = arith.constant 0 : i32
    return %c0_i32, %c0_i32_0 : i32, i32
  }
  func.func @transform_9(%arg0: i32) -> (i32, i32) {
    %c0_i32 = arith.constant 0 : i32
    %c0_i32_0 = arith.constant 0 : i32
    return %c0_i32, %arg0 : i32, i32
  }
}

</mosaic_0001>

<bundles_post_ra>
// kernel: mlp_arch_forward.1
= control target key start
LH: loop header
LB: loop body
LE: loop exit
PB: predicated region body
PF: predicated region fallthrough
CT: control target
= control target key end

     0   :  { %s1267_s0 = inlined_call_operand.vmem [shape: f32[16,256], index: 0, kind: input, shape index: {}]   ;;  %s1268_s1 = inlined_call_operand.vmem [shape: f32[32,16], index: 1, kind: input, shape index: {}]   ;;  %s1269_s2 = inlined_call_operand.vmem [shape: f32[32,1], index: 2, kind: input, shape index: {}]   ;;  %s1270_s3 = inlined_call_operand.vmem [shape: f32[16,32], index: 3, kind: input, shape index: {}]   ;;  %s1271_s4 = inlined_call_operand.vmem [shape: f32[16,1], index: 4, kind: input, shape index: {}]   ;;  %s1272_s5 = inlined_call_operand.vmem [shape: f32[8,16], index: 5, kind: input, shape index: {}]   ;;  %s1273_s6 = inlined_call_operand.vmem [shape: f32[8,1], index: 6, kind: input, shape index: {}]   ;;  %s1274_s7 = inlined_call_operand.vmem [shape: f32[1,8], index: 7, kind: input, shape index: {}]   ;;  %s1275_s8 = inlined_call_operand.<no memory space> [shape: f32[1,1], index: 8, kind: input, shape index: {}]   ;;  %s1276_s9 = inlined_call_operand.hbm [shape: f32[1,256], index: 9, kind: output, shape index: {}]  }
   0x1   :  { %v14_v0 = vstv %s1275_s8 }
   0x2   :  { %15 = vst [vmem:[#allocation2] sm:$0x1] %v14_v0 }
   0x3   :  { %16 = vsyncpa [#allocation5], 0 }
   0x4   :  { %18 = vsyncpa [#allocation5 + $0x1], 0  ;;  %s1105_s11 = smov 0   ;;  %s1107_s12 = smov 0  }
   0x5   :  { %s1109_s13 = smov 0   ;;  %s1111_s14 = smov 0  }
   0x6 LB: > { %s854_s8 = sadd.s32 4294967295, %s1045_s14   ;;  %s855_s15 = sadd.s32 4294967294, %s1045_s14   ;;  %s1045_s14 = sphi %s1111_s14, %s1282_s14   ;;  %s1041_s13 = sphi %s1109_s13, %s1281_s13   ;;  %s1037_s12 = sphi %s1107_s12, %s1280_s12   ;;  %s1033_s11 = sphi %s1105_s11, %s1279_s11  }
   0x7   : > { %s1128_s16 = sadd.s32 1, %s1045_s14   ;;  %s31_s17 = sadd.s32 1, %s1041_s13 }
   0x8   : > { %s28_s18 = ssub.s32 %s1045_s14, %s1128_s16  ;;  %p38_p0 = scmp.ne.s32.totalorder %s1041_s13, %s1037_s12 }
   0x9   : > { %p29_p1 = scmp.eq.s32.totalorder %s28_s18, 0  ;;  %p39_p2 = scmp.eq.s32.totalorder %s1045_s14, 0 }
   0xa   : > { %p236_p3 = scmp.eq.s32.totalorder %s854_s8, 1  ;;  %p241_p4 = scmp.ne.s32.totalorder %s1037_s12, %s1033_s11 }
   0xb   : > { %s1141_s19 = scalar_select %p29_p1, %s1041_s13, %s31_s17  }
   0xc   : > { %p40_p5 = por %p39_p2, %p38_p0  ;;  %p1143_p6 = por %p236_p3, %p38_p0 }
   0xd   : > { %p242_p7 = scmp.eq.s32.totalorder %s855_s15, 1  ;;  %p857_p9 = scmp.ge.s32.totalorder %s1045_s14, 2 }
   0xf   : > { %p1147_p8 = por %p242_p7, %p241_p4  ;;  %282 = sbr.rel (%p857_p9) target bundleno = 29 (0x1d), region = 48 }
  0x16   : > { %285 = sbr.rel (!%p40_p5) target bundleno = 29 (0x1d), region = 52  ;;  %s287_s22 = sand.u32 (%p40_p5), 1, %s1041_s13  }
  0x17   : > { %s859_s23 = sshll.u32 (%p40_p5), %s1045_s14, 3  ;;  %s858_s24 = sshll.u32 (%p40_p5), %s287_s22, 4 }
  0x18   : > { %s291_s27 = scalar_lea.vmem (%p40_p5), %s1267_s0, %s859_s23  ;;  %s289_s28 = scalar_lea.vmem (%p40_p5), [#allocation3], %s858_s24 }
  0x19   : > { %v321_v1 = vld [vmem:[%s291_s27] sm:$0xff] (%p40_p5)  ;;  %v323_v2 = vld [vmem:[%s291_s27 + $0x10] sm:$0xff] (%p40_p5) }
  0x1a   : > { %322 = vst [vmem:[%s289_s28] sm:$0xff] (%p40_p5), %v321_v1  ;;  %324 = vst [vmem:[%s289_s28 + $0x8] sm:$0xff] (%p40_p5), %v323_v2 }
  0x1d PF: > { %p860_p10 = scmp.ge.s32.totalorder %s1045_s14, 1  ;;  %p329_p11 = scmp.lt.s32.totalorder %s1045_s14, 3 }
  0x1f   : > { %p330_p12 = pnand %p860_p10, %p329_p11 }
  0x20   : > { %s1162_s29 = sand.u32 (!%p330_p12), 1, %s1037_s12   ;;  %v372_v3 = vld [vmem:[%s1268_s1] sm:$0xff] (!%p330_p12)  ;;  %vm400_vm0 = vcmask (!%p330_p12), 130048   ;;  %v1047_v4 = vmov (!%p330_p12), 0   ;;  %v378_v6 = vld [vmem:[%s1269_s2 + $0x10] sm:$0xff] (!%p330_p12)  ;;  %v377_v9 = vld [vmem:[%s1269_s2 + $0x8] sm:$0xff] (!%p330_p12)  ;;  %v702_v0 = vlaneseq (!%p330_p12) }
  0x21   : > { %333 = sbr.rel (%p330_p12) target bundleno = 939 (0x3ab), region = 90  ;;  %s861_s15 = sshll.u32 (!%p330_p12), %s1162_s29, 4  ;;  %894 = vmatprep.mubr.msk.f32.mxu0 (!%p330_p12), %vm400_vm0, %v372_v3  ;;  %981 = vset.pattern.permute.xlu0 (!%p330_p12), %v1047_v4  ;;  %v376_v5 = vld [vmem:[%s1269_s2] sm:$0xff] (!%p330_p12)  ;;  %v379_v11 = vld [vmem:[%s1269_s2 + $0x18] sm:$0xff] (!%p330_p12)  ;;  %v373_v12 = vld [vmem:[%s1268_s1 + $0x8] sm:$0xff] (!%p330_p12)  ;;  %vm524_vm1 = vcmask (!%p330_p12), 261120  }
  0x22   : > { %382 = vperm.xlu0 (!%p330_p12), %981, %v376_v5   ;;  %982 = vset.pattern.permute.xlu1 (!%p330_p12), %v1047_v4  ;;  %s338_s24 = scalar_lea.vmem (!%p330_p12), [#allocation3], %s861_s15  ;;  %v512_v13 = vld [vmem:[%s1271_s4] sm:$0xff] (!%p330_p12)  ;;  %v374_v14 = vld [vmem:[%s1268_s1 + $0x10] sm:$0xff] (!%p330_p12)  ;;  %v513_v15 = vld [vmem:[%s1271_s4 + $0x8] sm:$0xff] (!%p330_p12)  ;;  %v1048_v43 = vmov (!%p330_p12), 0.0|0.0   ;;  %vm1049_vm6 = vmmov (!%p330_p12), 0  }
  0x23   : > { %v370_v7 = vld [vmem:[%s338_s24] sm:$0xff] (!%p330_p12)  ;;  %v371_v8 = vld [vmem:[%s338_s24 + $0x8] sm:$0xff] (!%p330_p12)  ;;  %392 = vperm.xlu1 (!%p330_p12), %982, %v378_v6   ;;  %v1050_v44 = vmov (!%p330_p12), 0.0   ;;  %vm706_vm10 = vcmask (!%p330_p12), 64512   ;;  %v703_v1 = vshrl.u32 (!%p330_p12), %v702_v0, 7  ;;  %s870_s25 = sshll.u32 (!%p330_p12), %s854_s8, 4 }
  0x24   : > { %v923_v10 = vpack.c.bf16 (!%p330_p12), %v371_v8, %v370_v7  ;;  %v375_v16 = vld [vmem:[%s1268_s1 + $0x18] sm:$0xff] (!%p330_p12)  ;;  %v613_v17 = vld [vmem:[%s1273_s6] sm:$0xff] (!%p330_p12)  ;;  %v511_v42 = vld [vmem:[%s1270_s3 + $0x8] sm:$0xff] (!%p330_p12)  ;;  %s369_s26 = scalar_lea.vmem (!%p330_p12), [#allocation4], %s1162_s29  ;;  %s1223_s10 = scalar_lea.hbm (!%p330_p12), %s1276_s9, %s870_s25 }
  0x25   : > { %v696_v18 = vld [vmem:[#allocation2] sm:$0x1] (!%p330_p12)  ;;  %v704_v2 = vsub.s32 (!%p330_p12), 0, %v703_v1  ;;  %s794_s27 = sshll.u32 (!%p330_p12), %s369_s26, 4  ;;  %s782_s15 = scalar_lea.sflag (!%p330_p12), [#allocation5], %s1162_s29  ;;  %s1225_s27 = int_to_ptr.vmem [resolvable:$true] %s794_s27 }
  0x26   : > { %924 = vmatprep.subr.bf16.mxu0 (!%p330_p12), %v923_v10  ;;  %387 = vperm.xlu0 (!%p330_p12), %981, %v377_v9   ;;  %v510_v19 = vld [vmem:[%s1270_s3] sm:$0xff] (!%p330_p12)  ;;  %s983_s17 = scalar_lea.vmem (!%p330_p12), %s1225_s27, 16  ;;  %s1051_s8 = smov (!%p330_p12), [#allocation4]  }
  0x27   : > { %926 = vmatpush3.bf16.msra.mxu0 (!%p330_p12), %v923_v10  ;;  %397 = vperm.xlu1 (!%p330_p12), %982, %v379_v11   ;;  %v612_v56 = vld [vmem:[%s1272_s5] sm:$0xff] (!%p330_p12)  ;;  %p984_p13 = scmp.ne.s32.totalorder (!%p330_p12), %s1225_s27, %s983_s17  ;;  %s987_s18 = sshll.u32 (!%p330_p12), %s1051_s8, 4  ;;  %s988_s18 = int_to_ptr.vmem [resolvable:$false] %s987_s18 }
  0x28   : > { %908 = vmatprep.mubr.msk.f32.mxu1 %vm524_vm1, %v510_v19  ;;  %935 = vmatprep.subr.bf16.mxu0 %v1048_v43  ;;  %v695_v62 = vld [vmem:[%s1274_s7] sm:$0x1]  ;;  %s989_s22 = scalar_lea.vmem %s988_s18, 32  ;;  %p990_p2 = scmp.lt.s32.totalorder %s1225_s27, %s988_s18 }
  0x29   : > { %p985_p0 = pnand %p984_p13, %p1143_p6  ;;  %p991_p3 = scmp.lt.s32.totalorder %s989_s22, %s983_s17 }
  0x2a   : > { %895 = vmatmul.mubr.msk.f32.vlgmr.msra.gmra.mrb[0].mxu0 %vm400_vm0, %v373_v12  ;;  %516 = vperm.xlu0 %981, %v512_v13  }
  0x2b   : > { %897 = vmatprep.mubr.msk.f32.mxu0 %vm400_vm0, %v374_v14  ;;  %521 = vperm.xlu1 %982, %v513_v15   ;;  %p986_p1 = pneg %p985_p0  ;;  %p992_p4 = por %p991_p3, %p990_p2 }
  0x2d   : > { %p993_p5 = pnand %p992_p4, %p986_p1 }
  0x2e   : > { %898 = vmatmul.mubr.msk.f32.gmra.mrb[2].mxu0 %vm400_vm0, %v375_v16  ;;  %616 = vperm.xlu0 %981, %v613_v17  }
  0x2f   : > { %699 = vperm.xlu1 %982, %v696_v18   ;;  %915 = vmatprep.mubr.msk.f32.mxu0 %vm1049_vm6, %v1050_v44 }
  0xa1   : > { %v383_v20 = vpop.permute.xlu0 %382 }
  0xa2   : > { %v393_v21 = vpop.permute.xlu1 %392 }
  0xa5   : > { %v388_v22 = vpop.permute.xlu0 %387 }
  0xa6   : > { %v398_v28 = vpop.permute.xlu1 %397 }
  0xa9   : > { %v517_v47 = vpop.permute.xlu0 %516 }
  0xaa   : > { %v522_v45 = vpop.permute.xlu1 %521 }
  0xad   : > { %v617_v57 = vpop.permute.xlu0 %616 }
  0xae   : > { %v700_v3 = vpop.permute.xlu1 %699 }
  0xaf   : > { %v705_v4 = vrot.slane %v700_v3, %v704_v2 }
  0xfd   : > { %v896_v23 = vpop.f32.mrb[0].mxu0 }
  0xfe   : > { %v485_v24 = vadd.f32 %v896_v23, %v388_v22  ;;  %v479_v25 = vpop.f32.mrb[1].mxu0 }
  0xff   : > { %v480_v26 = vadd.f32 %v479_v25, %v383_v20 }
 0x100   : > { %v503_v27 = vmul.f32 0.02, %v485_v24  ;;  %vm499_vm2 = vcmp.ge.f32.partialorder %v485_v24, 0.0 }
 0x101   : > { %v502_v29 = vmul.f32 0.02, %v480_v26  ;;  %v899_v30 = vpop.f32.mrb[2].mxu0  ;;  %vm498_vm3 = vcmp.ge.f32.partialorder %v480_v26, 0.0 }
 0x102   : > { %v495_v31 = vadd.f32 %v899_v30, %v398_v28  ;;  %v489_v32 = vpop.f32.mrb[3].mxu0  ;;  %v507_v33 = vsel %vm499_vm2, %v485_v24, %v503_v27 }
 0x103   : > { %v490_v34 = vadd.f32 %v489_v32, %v393_v21  ;;  %v506_v35 = vsel %vm498_vm3, %v480_v26, %v502_v29 }
 0x104   : > { %vm501_vm4 = vcmp.ge.f32.partialorder %v495_v31, 0.0  ;;  %v505_v36 = vmul.f32 0.02, %v495_v31  ;;  %v927_v37 = vpack.c.bf16 %v507_v33, %v506_v35 }
 0x105   : > { %vm500_vm5 = vcmp.ge.f32.partialorder %v490_v34, 0.0  ;;  %v504_v38 = vmul.f32 0.02, %v490_v34 }
 0x106   : > { %928 = vmatprep.subr.bf16.mxu1 %v927_v37  ;;  %v509_v39 = vsel %vm501_vm4, %v495_v31, %v505_v36 }
 0x107   : > { %930 = vmatpush3.bf16.msra.mxu1 %v927_v37  ;;  %v508_v40 = vsel %vm500_vm5, %v490_v34, %v504_v38 }
 0x108   : > { %v931_v41 = vpack.c.bf16 %v509_v39, %v508_v40 }
 0x10a   : > { %932 = vmatprep.subr.bf16.mxu1 %v931_v41 }
 0x10b   : > { %934 = vmatpush3.bf16.msra.mxu1 %v931_v41 }
 0x10c   : > { %918 = vmatprep.subr.mxu1 %v1050_v44 }
 0x10e   : > { %909 = vmatmul.mubr.msk.f32.vlgmr.msra.gmra.mrb[0].mxu1 %vm524_vm1, %v511_v42 }
 0x10f   : > { %920 = vmatprep.mubr.msk.f32.mxu1 %vm1049_vm6, %v1050_v44 }
 0x1e1   : > { %v910_v46 = vpop.f32.mrb[0].mxu1 }
 0x1e2   : > { %v603_v48 = vadd.f32 %v910_v46, %v522_v45  ;;  %v597_v49 = vpop.f32.mrb[1].mxu1 }
 0x1e3   : > { %v598_v50 = vadd.f32 %v597_v49, %v517_v47 }
 0x1e4   : > { %vm607_vm7 = vcmp.ge.f32.partialorder %v603_v48, 0.0  ;;  %v609_v51 = vmul.f32 0.02, %v603_v48 }
 0x1e5   : > { %vm606_vm8 = vcmp.ge.f32.partialorder %v598_v50, 0.0  ;;  %v608_v52 = vmul.f32 0.02, %v598_v50 }
 0x1e6   : > { %v611_v53 = vsel %vm607_vm7, %v603_v48, %v609_v51 }
 0x1e7   : > { %v610_v54 = vsel %vm606_vm8, %v598_v50, %v608_v52 }
 0x1e8   : > { %v936_v55 = vpack.c.bf16 %v611_v53, %v610_v54 }
 0x1ea   : > { %937 = vmatpush3.bf16.msra.mxu0 %v936_v55 }
 0x1ed   : > { %916 = vmatmul.mubr.msk.f32.vlgmr.msra.gmra.mrb[4].mxu0 %vm400_vm0, %v612_v56 }
 0x2c0   : > { %v688_v58 = vpop.f32.mrb[4].mxu0 }
 0x2c1   : > { %v689_v59 = vadd.f32 %v688_v58, %v617_v57  ;;  %v917_v60 = vpop.f32.mrb[5].mxu0 }
 0x2c3   : > { %vm692_vm9 = vcmp.ge.f32.partialorder %v689_v59, 0.0  ;;  %v693_v61 = vmul.f32 0.02, %v689_v59 }
 0x2c5   : > { %v694_v63 = vsel %vm692_vm9, %v689_v59, %v693_v61 }
 0x2c6   : > { %919 = vmatpush3.msra.mxu1 %v694_v63 }
 0x2c7   : > { %921 = vmatmul.mubr.msk.f32.vlgmr.msra.gmra.mrb[2].mxu1 %vm706_vm10, %v695_v62 }
 0x39a   : > { %v776_v5 = vpop.f32.mrb[2].mxu1 }
 0x39b   : > { %v777_v6 = vadd.f32 %v776_v5, %v705_v4  ;;  %v922_v7 = vpop.f32.mrb[3].mxu1 }
 0x39d   : > { %780 = vst [vmem:[%s369_s26] sm:$0x1] %v777_v6 }
 0x39e   : > { %996 = shalt.err (!%p993_p5)
}
 0x39f   : > { %s997_s29 = scalar_lea.hbm %s1223_s10, 16  ;;  %s1001_s25 = scalar_lea.hbm %s1276_s9, 32 }
 0x3a0   : > { %p998_p7 = scmp.ne.s32.totalorder %s1223_s10, %s997_s29  ;;  %p1002_p12 = scmp.lt.u32.totalorder %s1223_s10, %s1276_s9 }
 0x3a1   : > { %p1003_p13 = scmp.lt.u32.totalorder %s1001_s25, %s997_s29  ;;  %p1005_p1 = scmp.lt.u32.totalorder %s997_s29, %s1223_s10 }
 0x3a2   : > { %p999_p10 = pnand %p998_p7, %p1143_p6 }
 0x3a3   : > { %p1004_p0 = por %p1003_p13, %p1002_p12 }
 0x3a4   : > { %p1000_p11 = pneg %p999_p10 }
 0x3a5   : > { %p1006_p2 = por %p1005_p1, %p1004_p0 }
 0x3a7   : > { %p1007_p3 = pnand %p1006_p2, %p1000_p11 }
 0x3a9   : > { %1010 = shalt.err (!%p1007_p3)
}
 0x3aa   : > { %938 = dma.vmem_to_hbm [thread:$0]  (%p1143_p6), %s1225_s27, 16, %s1223_s10, %s782_s15  }
 0x3ab PF: > { %s806_s30 = sand.u32 1, %s1033_s11   ;;  %p941_p4 = pnand %p857_p9, %p1147_p8 }
 0x3ac   : > { %s807_s17 = scalar_lea.sflag [#allocation5], %s806_s30 }
 0x3ad   : > { %1028 = dma.done.wait (!%p941_p4), %s807_s17, 16  }
 0x3ae   : > { %1030 = vsyncadd (!%p941_p4), %s807_s17, 4294967280  ;;  %p21_p5 = scmp.ge.s32.totalorder %s1128_s16, 4   ;;  %s1279_s11 = smov %s1037_s12 }
 0x3af   : > { %s1280_s12 = smov %s1041_s13  ;;  %s1281_s13 = smov %s1141_s19 }
 0x3b0   : > { %s1282_s14 = smov %s1128_s16  ;;  %23 = sbr.rel (!%p21_p5) target bundleno = 6 (0x6), region = 134 }
 0x3b7   :  { %811 = vsyncpa [#allocation5], 1 }
 0x3b8   :  { %813 = vsyncpa [#allocation5 + $0x1], 1 }

</bundles_post_ra>
